<compile_context>
chip_gen: v7x
topology: tpu7x:2x2x1
jax: 0.10.0
libtpu: 0.0.40
codegen_flags: <defaults>
</compile_context>

<pallas_src>
import functools

import jax
import jax.numpy as jnp
from jax.experimental import pallas as pl
from jax.experimental.pallas import tpu as pltpu


_MIN_GRID_STEPS = 4  # so v7x's two TensorCores each get >= 2 tiles of work


def _round_up(v, m):
    return (v + m - 1) // m * m


def _sublane_multiple(dtype):
    # Native sublane packing: 8 for 4-byte, 16 for 2-byte, 32 for 1-byte dtypes.
    return {4: 8, 2: 16, 1: 32}.get(jnp.dtype(dtype).itemsize, 8)


def _vmem_capacity_bytes():
    # Generation-aware VMEM query with a v7x-safe fallback (64 MiB per core).
    try:
        cap = getattr(pltpu.get_tpu_info(), "vmem_capacity_bytes", None)
        if cap:
            return int(cap)
    except Exception:
        pass
    return 64 * 1024 * 1024


def _entropy_kernel(x_ref, o_ref, *, scale, seg_len, mask_rows):
    tb, p = x_ref.shape
    g = p // seg_len
    x = x_ref[...]                                # native dtype; no hoisted f32 copy

    if mask_rows is not None:
        # Partial last tile: out-of-range rows may contain stale VMEM.  Zero
        # them so exp() stays finite (their outputs are discarded anyway).
        row = (jax.lax.broadcasted_iota(jnp.int32, (tb, p), 0)
               + pl.program_id(0) * tb)
        x = jnp.where(row < mask_rows, x, jnp.zeros_like(x))

    # Per original row (= lane segment of length seg_len): shifted logits
    # t = x - max(x).  max runs on the native dtype; only t is f32.
    t_cols = []
    for j in range(g):
        xs = x[:, j * seg_len:(j + 1) * seg_len]
        mj = jnp.max(xs, axis=1, keepdims=True)
        t_cols.append(xs.astype(jnp.float32) - mj.astype(jnp.float32))
    t = t_cols[0] if g == 1 else jnp.concatenate(t_cols, axis=1)   # (tb, p) f32

    # Single lane-dense EUP pass; reuse e for both logsumexp and pwa.
    e = jnp.exp(t)
    et = e * t

    es, ws = [], []
    for j in range(g):
        sl = slice(j * seg_len, (j + 1) * seg_len)
        es.append(jnp.sum(e[:, sl], axis=1, keepdims=True))
        ws.append(jnp.sum(et[:, sl], axis=1, keepdims=True))
    exp_sum = es[0] if g == 1 else jnp.concatenate(es, axis=1)     # (tb, g)
    w = ws[0] if g == 1 else jnp.concatenate(ws, axis=1)           # (tb, g)

    # entropy = log_sum - pwa = log(exp_sum) - sum(e*t)/exp_sum (max cancels).
    # Tiny (tb, g) tensors -> exact divide keeps the 1e-5 f32 tolerance.
    ent = (jnp.log(exp_sum) - w / exp_sum) * scale
    o_ref[...] = ent.astype(o_ref.dtype)


def entropy_forward(x, *, neg=False, block_rows=None, vmem_limit_bytes=None):
    """Pallas TPU implementation of Entropy.forward on a plain (B, C) tensor."""
    B, C = x.shape
    scale = float(1 - 2 * int(neg))
    isz = jnp.dtype(x.dtype).itemsize
    sub = _sublane_multiple(x.dtype)

    # ---- lane packing for small C (free: rows are contiguous in HBM) --------
    g = 1
    for d in range(max(1, 128 // C), 0, -1):
        if B % d == 0:
            g = d
            break
    Bp, P = B // g, g * C
    xp = x.reshape(Bp, P)

    # ---- generation-aware VMEM budget ---------------------------------------
    if vmem_limit_bytes is None:
        vmem_limit_bytes = max(32 * 1024 * 1024,
                               min(_vmem_capacity_bytes() * 3 // 4,
                                   96 * 1024 * 1024))
    if block_rows is None:
        # Per packed row: 2 double-buffered input copies + ~3 f32 (t, e, e*t)
        # full-width temporaries; keep the working set under ~half the limit.
        per_row = P * (2 * isz + 3 * 4)
        block_rows = max(sub, (int(vmem_limit_bytes) // 2) // per_row)

    # ---- tile rows: >= _MIN_GRID_STEPS steps when possible, sublane-aligned -
    split_cap = _round_up(max(1, -(-Bp // _MIN_GRID_STEPS)), sub)
    tb = max(1, min(int(block_rows), split_cap, Bp))
    if tb < Bp:
        tb = max(sub, (tb // sub) * sub)
    if tb >= Bp:
        tb = Bp                               # single block spanning the full batch dim
    grid = (pl.cdiv(Bp, tb),)
    mask_rows = Bp if (Bp % tb) else None     # only mask when a partial tile exists

    kernel = functools.partial(_entropy_kernel, scale=scale, seg_len=C,
                               mask_rows=mask_rows)
    out = pl.pallas_call(
        kernel,
        out_shape=jax.ShapeDtypeStruct((Bp, g), x.dtype),
        grid=grid,
        in_specs=[pl.BlockSpec((tb, P), lambda i: (i, 0))],
        out_specs=pl.BlockSpec((tb, g), lambda i: (i, 0)),
        compiler_params=pltpu.CompilerParams(
            dimension_semantics=("parallel",),   # batch tiles shard over v7x's 2 TCs
            vmem_limit_bytes=int(vmem_limit_bytes),
        ),
    )(xp)
    return out.reshape(B, 1)


def entropy_reference(x, *, neg=False):
    """Pure-JAX reference mirroring the PyTorch module line-by-line."""
    x = x.astype(jnp.float32)
    max_head = jnp.max(x, axis=1, keepdims=True)
    exp_sum = jnp.sum(jnp.exp(x - max_head), axis=1, keepdims=True)
    log_sum = jnp.log(exp_sum) + max_head
    softmax = jnp.exp(x - log_sum)
    pwa = jnp.sum(softmax * x, axis=1, keepdims=True)
    return (log_sum - pwa) * (1 - 2 * int(neg))


if __name__ == "__main__":
    # Module config: Entropy(dims=(C,), low_mem=False, neg=...)
    key = jax.random.PRNGKey(0)

    # Deterministic parameter init per __init__ (deepz_lambda = -ones(dims)).
    # Only used on the HybridZonotope (abstract-domain) path, which the plain
    # tensor forward never touches.
    C0 = 32
    exp_deepz_lambda = -jnp.ones((C0,), dtype=jnp.float32)
    lse_exp_deepz_lambda = -jnp.ones((C0,), dtype=jnp.float32)
    lse_log_deepz_lambda = -jnp.ones((1,), dtype=jnp.float32)
    # TODO(synk): HybridZonotope branch (zonotope exp/log/prod transformers) has
    # no plain-tensor equivalent and is not implemented.

    k1, k2, k3, k4, k5 = jax.random.split(key, 5)

    # --- test 1: small f32, C=32 packed 4-wide (g=4), single tile ---
    x1 = jax.random.normal(k1, (8, C0), dtype=jnp.float32)
    out1 = jax.block_until_ready(entropy_forward(x1, neg=False))
    ref1 = entropy_reference(x1, neg=False)
    assert out1.shape == (8, 1), out1.shape
    assert jnp.allclose(out1, ref1, atol=1e-5, rtol=1e-5), (out1, ref1)

    # --- test 2: C=40 (g=2), multi-tile grid with a masked partial tile, neg=True ---
    x2 = 3.0 * jax.random.normal(k2, (200, 40), dtype=jnp.float32)
    out2 = jax.block_until_ready(entropy_forward(x2, neg=True, block_rows=64))
    ref2 = entropy_reference(x2, neg=True)
    assert out2.shape == (200, 1), out2.shape
    assert jnp.allclose(out2, ref2, atol=1e-5, rtol=1e-5), (out2, ref2)

    # --- test 3: bf16 input (g=4 packing, 16-row sublane multiple), f32 internals ---
    x3 = jax.random.normal(k3, (64, C0), dtype=jnp.bfloat16)
    out3 = jax.block_until_ready(entropy_forward(x3, neg=False))
    ref3 = entropy_reference(x3.astype(jnp.float32), neg=False).astype(jnp.bfloat16)
    assert out3.shape == (64, 1), out3.shape
    assert jnp.allclose(out3.astype(jnp.float32), ref3.astype(jnp.float32),
                        atol=2e-2, rtol=2e-2), (out3, ref3)

    # --- test 4: C >= 128 -> no packing (g=1), multi-tile grid ---
    x4 = jax.random.normal(k4, (24, 160), dtype=jnp.float32)
    out4 = jax.block_until_ready(entropy_forward(x4, neg=False))
    ref4 = entropy_reference(x4, neg=False)
    assert out4.shape == (24, 1), out4.shape
    assert jnp.allclose(out4, ref4, atol=1e-5, rtol=1e-5), (out4, ref4)

    # --- test 5: prime batch (no divisor <= 128//C) -> packing falls back to g=1 ---
    x5 = jax.random.normal(k5, (7, C0), dtype=jnp.float32)
    out5 = jax.block_until_ready(entropy_forward(x5, neg=True))
    ref5 = entropy_reference(x5, neg=True)
    assert out5.shape == (7, 1), out5.shape
    assert jnp.allclose(out5, ref5, atol=1e-5, rtol=1e-5), (out5, ref5)

    print("KERNEL_OK")
</pallas_src>

<mosaic_0001>
module attributes {stable_mosaic.version = 11 : i64} {
  func.func @_entropy_kernel(%arg0: i32, %arg1: memref<2x128xf32, #tpu.memory_space<vmem>>, %arg2: memref<2x4xf32, #tpu.memory_space<vmem>>) attributes {dimension_semantics = [#tpu.dimension_semantics<parallel>], iteration_bounds = array<i64: 1>, scalar_prefetch = 0 : i64, scratch_operands = 0 : i64, tpu.core_type = #tpu.core_type<tc>, window_params = [{transform_indices = @transform_0, window_bounds = array<i64: 2, 128>}, {transform_indices = @transform_1, window_bounds = array<i64: 2, 4>}]} {
    %c0 = arith.constant 0 : index
    %c0_0 = arith.constant 0 : index
    %0 = vector.load %arg1[%c0, %c0_0] : memref<2x128xf32, #tpu.memory_space<vmem>>, vector<2x128xf32>
    %1 = vector.extract_strided_slice %0 {offsets = [0, 0], sizes = [2, 32], strides = [1, 1]} : vector<2x128xf32> to vector<2x32xf32>
    %cst = arith.constant dense<0xFF800000> : vector<2xf32>
    %2 = vector.multi_reduction <maximumf>, %1, %cst [1] : vector<2x32xf32> to vector<2xf32>
    %3 = vector.shape_cast %2 : vector<2xf32> to vector<2x1xf32>
    %4 = vector.broadcast %3 : vector<2x1xf32> to vector<2x32xf32>
    %5 = arith.subf %1, %4 : vector<2x32xf32>
    %6 = vector.extract_strided_slice %0 {offsets = [0, 32], sizes = [2, 32], strides = [1, 1]} : vector<2x128xf32> to vector<2x32xf32>
    %cst_1 = arith.constant dense<0xFF800000> : vector<2xf32>
    %7 = vector.multi_reduction <maximumf>, %6, %cst_1 [1] : vector<2x32xf32> to vector<2xf32>
    %8 = vector.shape_cast %7 : vector<2xf32> to vector<2x1xf32>
    %9 = vector.broadcast %8 : vector<2x1xf32> to vector<2x32xf32>
    %10 = arith.subf %6, %9 : vector<2x32xf32>
    %11 = vector.extract_strided_slice %0 {offsets = [0, 64], sizes = [2, 32], strides = [1, 1]} : vector<2x128xf32> to vector<2x32xf32>
    %cst_2 = arith.constant dense<0xFF800000> : vector<2xf32>
    %12 = vector.multi_reduction <maximumf>, %11, %cst_2 [1] : vector<2x32xf32> to vector<2xf32>
    %13 = vector.shape_cast %12 : vector<2xf32> to vector<2x1xf32>
    %14 = vector.broadcast %13 : vector<2x1xf32> to vector<2x32xf32>
    %15 = arith.subf %11, %14 : vector<2x32xf32>
    %16 = vector.extract_strided_slice %0 {offsets = [0, 96], sizes = [2, 32], strides = [1, 1]} : vector<2x128xf32> to vector<2x32xf32>
    %cst_3 = arith.constant dense<0xFF800000> : vector<2xf32>
    %17 = vector.multi_reduction <maximumf>, %16, %cst_3 [1] : vector<2x32xf32> to vector<2xf32>
    %18 = vector.shape_cast %17 : vector<2xf32> to vector<2x1xf32>
    %19 = vector.broadcast %18 : vector<2x1xf32> to vector<2x32xf32>
    %20 = arith.subf %16, %19 : vector<2x32xf32>
    %21 = tpu.concatenate %5, %10, %15, %20 in 1 : vector<2x32xf32>, vector<2x32xf32>, vector<2x32xf32>, vector<2x32xf32> -> vector<2x128xf32>
    %22 = math.exp %21 : vector<2x128xf32>
    %23 = arith.mulf %22, %21 : vector<2x128xf32>
    %24 = vector.extract_strided_slice %22 {offsets = [0, 0], sizes = [2, 32], strides = [1, 1]} : vector<2x128xf32> to vector<2x32xf32>
    %cst_4 = arith.constant dense<0.000000e+00> : vector<2xf32>
    %25 = vector.multi_reduction <add>, %24, %cst_4 [1] : vector<2x32xf32> to vector<2xf32>
    %26 = vector.shape_cast %25 : vector<2xf32> to vector<2x1xf32>
    %27 = vector.extract_strided_slice %23 {offsets = [0, 0], sizes = [2, 32], strides = [1, 1]} : vector<2x128xf32> to vector<2x32xf32>
    %cst_5 = arith.constant dense<0.000000e+00> : vector<2xf32>
    %28 = vector.multi_reduction <add>, %27, %cst_5 [1] : vector<2x32xf32> to vector<2xf32>
    %29 = vector.shape_cast %28 : vector<2xf32> to vector<2x1xf32>
    %30 = vector.extract_strided_slice %22 {offsets = [0, 32], sizes = [2, 32], strides = [1, 1]} : vector<2x128xf32> to vector<2x32xf32>
    %cst_6 = arith.constant dense<0.000000e+00> : vector<2xf32>
    %31 = vector.multi_reduction <add>, %30, %cst_6 [1] : vector<2x32xf32> to vector<2xf32>
    %32 = vector.shape_cast %31 : vector<2xf32> to vector<2x1xf32>
    %33 = vector.extract_strided_slice %23 {offsets = [0, 32], sizes = [2, 32], strides = [1, 1]} : vector<2x128xf32> to vector<2x32xf32>
    %cst_7 = arith.constant dense<0.000000e+00> : vector<2xf32>
    %34 = vector.multi_reduction <add>, %33, %cst_7 [1] : vector<2x32xf32> to vector<2xf32>
    %35 = vector.shape_cast %34 : vector<2xf32> to vector<2x1xf32>
    %36 = vector.extract_strided_slice %22 {offsets = [0, 64], sizes = [2, 32], strides = [1, 1]} : vector<2x128xf32> to vector<2x32xf32>
    %cst_8 = arith.constant dense<0.000000e+00> : vector<2xf32>
    %37 = vector.multi_reduction <add>, %36, %cst_8 [1] : vector<2x32xf32> to vector<2xf32>
    %38 = vector.shape_cast %37 : vector<2xf32> to vector<2x1xf32>
    %39 = vector.extract_strided_slice %23 {offsets = [0, 64], sizes = [2, 32], strides = [1, 1]} : vector<2x128xf32> to vector<2x32xf32>
    %cst_9 = arith.constant dense<0.000000e+00> : vector<2xf32>
    %40 = vector.multi_reduction <add>, %39, %cst_9 [1] : vector<2x32xf32> to vector<2xf32>
    %41 = vector.shape_cast %40 : vector<2xf32> to vector<2x1xf32>
    %42 = vector.extract_strided_slice %22 {offsets = [0, 96], sizes = [2, 32], strides = [1, 1]} : vector<2x128xf32> to vector<2x32xf32>
    %cst_10 = arith.constant dense<0.000000e+00> : vector<2xf32>
    %43 = vector.multi_reduction <add>, %42, %cst_10 [1] : vector<2x32xf32> to vector<2xf32>
    %44 = vector.shape_cast %43 : vector<2xf32> to vector<2x1xf32>
    %45 = vector.extract_strided_slice %23 {offsets = [0, 96], sizes = [2, 32], strides = [1, 1]} : vector<2x128xf32> to vector<2x32xf32>
    %cst_11 = arith.constant dense<0.000000e+00> : vector<2xf32>
    %46 = vector.multi_reduction <add>, %45, %cst_11 [1] : vector<2x32xf32> to vector<2xf32>
    %47 = vector.shape_cast %46 : vector<2xf32> to vector<2x1xf32>
    %48 = tpu.concatenate %26, %32, %38, %44 in 1 : vector<2x1xf32>, vector<2x1xf32>, vector<2x1xf32>, vector<2x1xf32> -> vector<2x4xf32>
    %49 = tpu.concatenate %29, %35, %41, %47 in 1 : vector<2x1xf32>, vector<2x1xf32>, vector<2x1xf32>, vector<2x1xf32> -> vector<2x4xf32>
    %50 = math.log %48 : vector<2x4xf32>
    %51 = arith.divf %49, %48 : vector<2x4xf32>
    %52 = arith.subf %50, %51 : vector<2x4xf32>
    %cst_12 = arith.constant 1.000000e+00 : f32
    %53 = vector.broadcast %cst_12 : f32 to vector<2x4xf32>
    %54 = arith.mulf %52, %53 : vector<2x4xf32>
    %c0_13 = arith.constant 0 : index
    %c0_14 = arith.constant 0 : index
    %55 = vector.load %arg2[%c0_13, %c0_14] : memref<2x4xf32, #tpu.memory_space<vmem>>, vector<2x4xf32>
    tpu.vector_store %arg2[%c0_13, %c0_14], %54 {strides = array<i32>} : memref<2x4xf32, #tpu.memory_space<vmem>>, vector<2x4xf32>,
    return
  }
  func.func @transform_0(%arg0: i32) -> (i32, i32) {
    %c0_i32 = arith.constant 0 : i32
    %c0_i32_0 = arith.constant 0 : i32
    return %arg0, %c0_i32 : i32, i32
  }
  func.func @transform_1(%arg0: i32) -> (i32, i32) {
    %c0_i32 = arith.constant 0 : i32
    %c0_i32_0 = arith.constant 0 : i32
    return %arg0, %c0_i32 : i32, i32
  }
}

</mosaic_0001>

<bundles_post_ra>
// kernel: tpu_custom_call.1
= control target key start
LH: loop header
LB: loop body
LE: loop exit
PB: predicated region body
PF: predicated region fallthrough
CT: control target
= control target key end

     0   :  { %6 = vsyncpa [#allocation3], 0  ;;  %s233_s0 = inlined_call_operand.hbm [shape: f32[2,128], index: 0, kind: input, shape index: {}]   ;;  %s234_s1 = inlined_call_operand.hbm [shape: f32[2,4], index: 1, kind: output, shape index: {}]  }
   0x1   :  { %7 = vsyncpa [#allocation4], 0  ;;  %s185_s6 = smov [#allocation2]   ;;  %s137_s10 = scalar_lea.hbm %s233_s0, 32 }
   0x2   :  { %s14_s7 = sshll.u32 %s185_s6, 4  ;;  %p138_p0 = scmp.ne.s32.totalorder %s233_s0, %s137_s10  ;;  %s15_s7 = int_to_ptr.vmem [resolvable:$true] %s14_s7 }
   0x3   :  { %p141_p1 = scmp.lt.u32.totalorder %s137_s10, %s233_s0 }
   0x5   :  { %p143_p2 = pnand %p141_p1, %p138_p0 }
   0x7   :  { %146 = shalt.err (!%p143_p2)
}
   0x8   :  { %s147_s15 = scalar_lea.vmem %s15_s7, 32  ;;  %p152_p4 = scmp.lt.s32.totalorder %s15_s7, %s15_s7 }
   0x9   :  { %p148_p3 = scmp.ne.s32.totalorder %s15_s7, %s147_s15  ;;  %p153_p5 = scmp.lt.s32.totalorder %s147_s15, %s147_s15 }
   0xb   :  { %p154_p6 = por %p153_p5, %p152_p4 }
   0xd   :  { %p155_p7 = pnand %p154_p6, %p148_p3 }
   0xf   :  { %158 = shalt.err (!%p155_p7)
}
  0x10   :  { %17 = dma.hbm_to_vmem [thread:$0]  %s233_s0, 32, %s15_s7, [#allocation3]  }
  0x11   :  { %181 = dma.done.wait [#allocation3], 32  }
  0x12   :  { %182 = vsyncadd [#allocation3], 4294967264  ;;  %vm22_vm0 = vcmask 254976   ;;  %vm32_vm1 = vcmask 779776   ;;  %v21_v0 = vld [vmem:[#allocation2] sm:$0x3] }
  0x13   :  { %vm27_vm2 = vcmask 517376   ;;  %vm37_vm3 = vcmask 1042176   ;;  %v23_v1 = vsel %vm22_vm0, %v21_v0, -inf  ;;  %v33_v2 = vsel %vm32_vm1, %v21_v0, -inf  ;;  %s186_s0 = smov 64   ;;  %s187_s18 = smov 96  }
  0x14   :  { %24 = vmax.xlane.f32.xlu0 %v23_v1  ;;  %34 = vmax.xlane.f32.xlu1 %v33_v2  ;;  %v28_v3 = vsel %vm27_vm2, %v21_v0, -inf  ;;  %v38_v4 = vsel %vm37_vm3, %v21_v0, -inf  ;;  %vm42_vm4 = vcmask 261120   ;;  %vm44_vm5 = vcmask 523264   ;;  %s188_s19 = smov 32   ;;  %s189_s20 = smov [#allocation5]  }
  0x15   :  { %vm46_vm6 = vcmask 785408   ;;  %vm95_vm7 = vcmask 7168   ;;  %vm97_vm8 = vcmask 15360   ;;  %vm99_vm9 = vcmask 23552   ;;  %s117_s21 = sshll.u32 %s189_s20, 4  ;;  %s118_s21 = int_to_ptr.vmem [resolvable:$true] %s117_s21 }
  0x16   :  { %vm109_vm10 = vcmask 25600   ;;  %s159_s22 = scalar_lea.vmem %s118_s21, 32  ;;  %p164_p9 = scmp.lt.s32.totalorder %s118_s21, %s118_s21 }
  0x17   :  { %p160_p8 = scmp.ne.s32.totalorder %s118_s21, %s159_s22  ;;  %p165_p10 = scmp.lt.s32.totalorder %s159_s22, %s159_s22 }
  0x18   :  { %29 = vmax.xlane.f32.xlu0 %v28_v3  ;;  %39 = vmax.xlane.f32.xlu1 %v38_v4 }
  0x19   :  { %p166_p11 = por %p165_p10, %p164_p9 }
  0x1b   :  { %p167_p12 = pnand %p166_p11, %p160_p8 }
  0xa1   :  { %v25_v5 = vpop.xlane.xlu0 %24  ;;  %v35_v6 = vpop.xlane.xlu1 %34 }
  0xa2   :  { %v26_v9 = vsub.f32 %v21_v0, %v25_v5  ;;  %v36_v12 = vsub.f32 %v21_v0, %v35_v6 }
  0xa5   :  { %v30_v7 = vpop.xlane.xlu0 %29  ;;  %v40_v8 = vpop.xlane.xlu1 %39 }
  0xa6   :  { %v31_v10 = vsub.f32 %v21_v0, %v30_v7  ;;  %v41_v11 = vsub.f32 %v21_v0, %v40_v8 }
  0xa8   :  { %v43_v13 = vsel %vm42_vm4, %v26_v9, %v31_v10 }
  0xa9   :  { %v45_v14 = vsel %vm44_vm5, %v43_v13, %v36_v12 }
  0xaa   :  { %v47_v15 = vsel %vm46_vm6, %v45_v14, %v41_v11 }
  0xab   :  { %v48_v16 = vmul.f32 1.442695, %v47_v15 }
  0xad   :  { %131 = vpow2.f32 %v48_v16 }
  0xb7   :  { %v132_v17 = vpop.eup %131 }
  0xb8   :  { %71 = vrot.lane.b32.xlu1 %v132_v17, %s186_s0  ;;  %58 = vrot.lane.b32.xlu0 %v132_v17, %s187_s18  ;;  %v51_v18 = vsel %vm22_vm0, %v132_v17, 0.0  ;;  %v50_v19 = vmul.f32 %v132_v17, %v47_v15 }
  0xba   :  { %v54_v20 = vsel %vm22_vm0, %v50_v19, 0.0 }
  0xbc   :  { %83 = vrot.lane.b32.xlu1 %v132_v17, %s188_s19 }
  0xd7   :  { %52 = vadd.xlane.f32.xlu0 %v51_v18 }
  0xe0   :  { %55 = vadd.xlane.f32.xlu1 %v54_v20 }
  0xed   :  { %65 = vrot.lane.b32.xlu0 %v50_v19, %s187_s18 }
  0xf1   :  { %89 = vrot.lane.b32.xlu0 %v50_v19, %s188_s19 }
 0x12a   :  { %v72_v21 = vpop.permute.xlu1 %71  ;;  %v59_v22 = vpop.permute.xlu0 %58 }
 0x12b   :  { %v74_v23 = vsel %vm22_vm0, %v72_v21, 0.0  ;;  %v61_v24 = vsel %vm22_vm0, %v59_v22, 0.0 }
 0x12c   :  { %75 = vadd.xlane.f32.xlu0 %v74_v23  ;;  %62 = vadd.xlane.f32.xlu1 %v61_v24 }
 0x12e   :  { %v84_v30 = vpop.permute.xlu1 %83 }
 0x12f   :  { %v86_v35 = vsel %vm22_vm0, %v84_v30, 0.0 }
 0x13d   :  { %77 = vrot.lane.b32.xlu1 %v50_v19, %s186_s0 }
 0x164   :  { %v53_v25 = vpop.xlane.xlu0 %52 }
 0x168   :  { %v66_v26 = vpop.permute.xlu0 %65 }
 0x169   :  { %v68_v27 = vsel %vm22_vm0, %v66_v26, 0.0 }
 0x16a   :  { %69 = vadd.xlane.f32.xlu1 %v68_v27 }
 0x16c   :  { %v90_v28 = vpop.permute.xlu0 %89 }
 0x16d   :  { %v92_v29 = vsel %vm22_vm0, %v90_v28, 0.0  ;;  %v56_v31 = vpop.xlane.xlu1 %55 }
 0x16e   :  { %93 = vadd.xlane.f32.xlu1 %v92_v29 }
 0x1b9   :  { %v63_v32 = vpop.xlane.xlu1 %62  ;;  %v76_v36 = vpop.xlane.xlu0 %75 }
 0x1ba   :  { %v96_v38 = vsel %vm95_vm7, %v53_v25, %v63_v32 }
 0x1bb   :  { %v98_v39 = vsel %vm97_vm8, %v96_v38, %v76_v36 }
 0x1bd   :  { %v78_v33 = vpop.permute.xlu1 %77 }
 0x1be   :  { %v80_v34 = vsel %vm22_vm0, %v78_v33, 0.0 }
 0x1bf   :  { %81 = vadd.xlane.f32.xlu0 %v80_v34 }
 0x1c3   :  { %87 = vadd.xlane.f32.xlu0 %v86_v35 }
 0x1f7   :  { %v70_v42 = vpop.xlane.xlu1 %69 }
 0x1f8   :  { %v101_v43 = vsel %vm95_vm7, %v56_v31, %v70_v42 }
 0x1fb   :  { %v94_v46 = vpop.xlane.xlu1 %93 }
 0x24c   :  { %v82_v37 = vpop.xlane.xlu0 %81 }
 0x24d   :  { %v102_v44 = vsel %vm97_vm8, %v101_v43, %v82_v37 }
 0x24e   :  { %v103_v48 = vsel %vm99_vm9, %v102_v44, %v94_v46 }
 0x250   :  { %v88_v40 = vpop.xlane.xlu0 %87 }
 0x251   :  { %v100_v41 = vsel %vm99_vm9, %v98_v39, %v88_v40 }
 0x252   :  { %133 = vlog2.f32 %v100_v41 }
 0x253   :  { %135 = vrcp.f32 %v100_v41 }
 0x25c   :  { %v134_v45 = vpop.eup %133 }
 0x25d   :  { %v136_v47 = vpop.eup %135  ;;  %v105_v49 = vmul.f32 0.6931472, %v134_v45 }
 0x25e   :  { %v107_v50 = vmul.f32 %v136_v47, %v103_v48 }
 0x260   :  { %v108_v51 = vsub.f32 %v105_v49, %v107_v50 }
 0x262   :  { %110 = vst.msk [vmem:[#allocation5] sm:$0x3] %vm109_vm10, %v108_v51 }
 0x263   :  { %170 = shalt.err (!%p167_p12)
}
 0x264   :  { %s171_s25 = scalar_lea.hbm %s234_s1, 32 }
 0x265   :  { %p172_p13 = scmp.ne.s32.totalorder %s234_s1, %s171_s25  ;;  %p175_p0 = scmp.lt.u32.totalorder %s171_s25, %s234_s1 }
 0x267   :  { %p177_p1 = pnand %p175_p0, %p172_p13 }
 0x269   :  { %180 = shalt.err (!%p177_p1)
}
 0x26a   :  { %120 = dma.vmem_to_hbm [thread:$0]  %s118_s21, 32, %s234_s1, [#allocation4]  }
 0x26b   :  { %183 = dma.done.wait [#allocation4], 32  }
 0x26c   :  { %184 = vsyncadd [#allocation4], 4294967264 }
 0x26d   :  { %124 = vsyncpa [#allocation3], 1 }
 0x26e   :  { %125 = vsyncpa [#allocation4], 1 }

</bundles_post_ra>
